<compile_context>
chip_gen: v6e
topology: v6e:2x2x1
jax: 0.10.0
libtpu: 0.0.40
codegen_flags: <defaults>
</compile_context>

<pallas_src>
from functools import partial

import jax
import jax.numpy as jnp
from jax import lax
from jax.experimental import pallas as pl
from jax.experimental.pallas import tpu as pltpu

EPS = 1e-5


# ----------------------------- pass 1: conv3x3 + BN1 stats -----------------------------
def _conv_stats_kernel(pT_ref, w1t_ref, y1_ref, s1_ref, q1_ref):
    """pT_ref: (K, TM); w1t_ref: (Cout, K); y1_ref: (Cout, TM); s1/q1: (Cout, 1) accumulators."""
    y1 = jnp.dot(w1t_ref[...], pT_ref[...], preferred_element_type=jnp.float32)
    y1_ref[...] = y1

    @pl.when(pl.program_id(0) == 0)
    def _init():
        s1_ref[...] = jnp.zeros_like(s1_ref)
        q1_ref[...] = jnp.zeros_like(q1_ref)

    # padded (zero) columns contribute 0 to both sums -> no masking needed here
    s1_ref[...] += jnp.sum(y1, axis=1, keepdims=True)
    q1_ref[...] += jnp.sum(y1 * y1, axis=1, keepdims=True)


# ------------------------ pass 2: BN1 + ReLU + conv1x1 + BN2 stats ----------------------
def _bn_conv1x1_stats_kernel(y1_ref, sc1_ref, sh1_ref, w2t_ref,
                             y2_ref, s2_ref, q2_ref, *, m_real):
    """y1_ref: (Cout, TM); sc1/sh1: (Cout, 1); w2t_ref: (Cout, Cout); y2_ref: (Cout, TM)."""
    tm = y1_ref.shape[1]
    z = jnp.maximum(y1_ref[...] * sc1_ref[...] + sh1_ref[...], 0.0)
    y2 = jnp.dot(w2t_ref[...], z, preferred_element_type=jnp.float32)
    y2_ref[...] = y2

    # mask out the M-padding columns (they are nonzero after BN1 shift) for the BN2 stats
    col = pl.program_id(0) * tm + lax.broadcasted_iota(jnp.int32, y2.shape, 1)
    y2m = jnp.where(col < m_real, y2, 0.0)

    @pl.when(pl.program_id(0) == 0)
    def _init():
        s2_ref[...] = jnp.zeros_like(s2_ref)
        q2_ref[...] = jnp.zeros_like(q2_ref)

    s2_ref[...] += jnp.sum(y2m, axis=1, keepdims=True)
    q2_ref[...] += jnp.sum(y2m * y2m, axis=1, keepdims=True)


# --------------------------------- pass 3: BN2 + ReLU -----------------------------------
def _bn_relu_kernel(y2_ref, sc2_ref, sh2_ref, out_ref):
    out_ref[...] = jnp.maximum(y2_ref[...] * sc2_ref[...] + sh2_ref[...], 0.0)


def sepconv_group_off(x_nchw, w1, w2, g1, b1, g2, b2, *, stride=2, padding=1, tm_max=2048):
    """x_nchw: (N, Cin, H, W); w1: (KH, KW, Cin, Cout); w2: (Cout, Cout); g/b: (Cout,).
    Returns (N, Cout, Hout, Wout)."""
    n, cin, h, w = x_nchw.shape
    kh, kw, _, cout = w1.shape
    ho = (h + 2 * padding - kh) // stride + 1
    wo = (w + 2 * padding - kw) // stride + 1
    m = n * ho * wo
    k = kh * kw * cin

    # --- glue: NCHW -> NHWC, pad, im2col as a single lane-dense (K, M) array ---
    # TODO(synk): the im2col still materializes ~KH*KW x the input volume in HBM; a fully
    # streaming version would read x_pad once with in-kernel strided pl.ds windows.
    x_nhwc = jnp.transpose(x_nchw, (0, 2, 3, 1)).astype(jnp.float32)
    x_pad = jnp.pad(x_nhwc, ((0, 0), (padding, padding), (padding, padding), (0, 0)))
    cols = []
    for ih in range(kh):
        for iw in range(kw):
            cols.append(x_pad[:, ih:ih + stride * (ho - 1) + 1:stride,
                                 iw:iw + stride * (wo - 1) + 1:stride, :])
    patches = jnp.concatenate(cols, axis=-1).reshape(m, k)   # (M, K), K index = (kh, kw, cin)
    pT = patches.T                                           # (K, M), M on the lane axis

    # --- tile over M (lane axis); pad M to a multiple of the tile ---
    tm = min(tm_max, pl.cdiv(m, 128) * 128)
    mp = pl.cdiv(m, tm) * tm
    grid = (mp // tm,)
    if mp != m:
        pT = jnp.pad(pT, ((0, 0), (0, mp - m)))

    w1t = w1.reshape(k, cout).T.astype(jnp.float32)   # (Cout, K)   -> y1ᵀ = W1ᵀ @ Pᵀ
    w2t = w2.T.astype(jnp.float32)                    # (Cout, Cout)-> y2ᵀ = W2ᵀ @ zᵀ

    def col_spec(c):
        return pl.BlockSpec((c, tm), lambda i: (0, i))

    def full_spec(shape):
        return pl.BlockSpec(shape, lambda i: (0, 0))

    stat_shape = jax.ShapeDtypeStruct((cout, 1), jnp.float32)
    inv_m = 1.0 / float(m)

    # ---------------- pass 1: fused K=KH*KW*Cin conv matmul + BN1 sum/sumsq ----------------
    y1, s1, q1 = pl.pallas_call(
        _conv_stats_kernel,
        grid=grid,
        in_specs=[col_spec(k), full_spec((cout, k))],
        out_specs=(col_spec(cout), full_spec((cout, 1)), full_spec((cout, 1))),
        out_shape=(jax.ShapeDtypeStruct((cout, mp), jnp.float32), stat_shape, stat_shape),
        compiler_params=pltpu.CompilerParams(dimension_semantics=("arbitrary",)),
    )(pT, w1t)

    mean1 = s1 * inv_m
    var1 = q1 * inv_m - mean1 * mean1
    sc1 = g1.reshape(cout, 1).astype(jnp.float32) * lax.rsqrt(var1 + EPS)
    sh1 = b1.reshape(cout, 1).astype(jnp.float32) - mean1 * sc1

    # -------------- pass 2: BN1 + ReLU + 1x1 conv matmul + BN2 sum/sumsq -------------------
    y2, s2, q2 = pl.pallas_call(
        partial(_bn_conv1x1_stats_kernel, m_real=m),
        grid=grid,
        in_specs=[col_spec(cout), full_spec((cout, 1)), full_spec((cout, 1)),
                  full_spec((cout, cout))],
        out_specs=(col_spec(cout), full_spec((cout, 1)), full_spec((cout, 1))),
        out_shape=(jax.ShapeDtypeStruct((cout, mp), jnp.float32), stat_shape, stat_shape),
        compiler_params=pltpu.CompilerParams(dimension_semantics=("arbitrary",)),
    )(y1, sc1, sh1, w2t)

    mean2 = s2 * inv_m
    var2 = q2 * inv_m - mean2 * mean2
    sc2 = g2.reshape(cout, 1).astype(jnp.float32) * lax.rsqrt(var2 + EPS)
    sh2 = b2.reshape(cout, 1).astype(jnp.float32) - mean2 * sc2

    # -------------------------------- pass 3: BN2 + ReLU -----------------------------------
    out_t = pl.pallas_call(
        _bn_relu_kernel,
        grid=grid,
        in_specs=[col_spec(cout), full_spec((cout, 1)), full_spec((cout, 1))],
        out_specs=col_spec(cout),
        out_shape=jax.ShapeDtypeStruct((cout, mp), jnp.float32),
        compiler_params=pltpu.CompilerParams(dimension_semantics=("parallel",)),
    )(y2, sc2, sh2)

    # glue: (Cout, M) -> NCHW
    out = out_t[:, :m].reshape(cout, n, ho, wo)
    return jnp.transpose(out, (1, 0, 2, 3))


def _reference(x_nchw, w1, w2, g1, b1, g2, b2, *, stride=2, padding=1):
    """Pure-JAX reference with XLA convs, mirroring the PyTorch forward (training-mode BN)."""
    w1_oihw = jnp.transpose(w1, (3, 2, 0, 1))
    y = lax.conv_general_dilated(x_nchw, w1_oihw, (stride, stride),
                                 ((padding, padding), (padding, padding)))
    mean = y.mean(axis=(0, 2, 3), keepdims=True)
    var = y.var(axis=(0, 2, 3), keepdims=True)
    y = (y - mean) / jnp.sqrt(var + EPS) * g1.reshape(1, -1, 1, 1) + b1.reshape(1, -1, 1, 1)
    y = jnp.maximum(y, 0.0)

    w2_oihw = w2.T[:, :, None, None]
    y = lax.conv_general_dilated(y, w2_oihw, (1, 1), ((0, 0), (0, 0)))
    mean = y.mean(axis=(0, 2, 3), keepdims=True)
    var = y.var(axis=(0, 2, 3), keepdims=True)
    y = (y - mean) / jnp.sqrt(var + EPS) * g2.reshape(1, -1, 1, 1) + b2.reshape(1, -1, 1, 1)
    return jnp.maximum(y, 0.0)


if __name__ == "__main__":
    N, CIN, COUT, H, W = 2, 4, 8, 16, 16

    key = jax.random.PRNGKey(0)
    kx, kw1, kw2 = jax.random.split(key, 3)
    x = jax.random.normal(kx, (N, CIN, H, W), jnp.float32)
    w1 = jax.random.normal(kw1, (3, 3, CIN, COUT), jnp.float32) * 0.1   # Conv2d(CIN, COUT, 3, s=2, p=1)
    w2 = jax.random.normal(kw2, (COUT, COUT), jnp.float32) * 0.1        # Conv2d(COUT, COUT, 1)
    g1 = jnp.ones((COUT,), jnp.float32)   # BatchNorm affine defaults
    b1 = jnp.zeros((COUT,), jnp.float32)
    g2 = jnp.ones((COUT,), jnp.float32)
    b2 = jnp.zeros((COUT,), jnp.float32)

    out = sepconv_group_off(x, w1, w2, g1, b1, g2, b2)
    out = jax.block_until_ready(out)

    ref = jax.block_until_ready(_reference(x, w1, w2, g1, b1, g2, b2))
    assert out.shape == (N, COUT, H // 2, W // 2), out.shape
    assert jnp.allclose(out, ref, atol=1e-4, rtol=1e-4), float(jnp.max(jnp.abs(out - ref)))

    print("KERNEL_OK")
</pallas_src>

<mosaic_0001>
module attributes {stable_mosaic.version = 11 : i64} {
  func.func @_conv_stats_kernel(%arg0: i32, %arg1: memref<36x128xf32, #tpu.memory_space<vmem>>, %arg2: memref<8x36xf32, #tpu.memory_space<vmem>>, %arg3: memref<8x128xf32, #tpu.memory_space<vmem>>, %arg4: memref<8x1xf32, #tpu.memory_space<vmem>>, %arg5: memref<8x1xf32, #tpu.memory_space<vmem>>) attributes {dimension_semantics = [#tpu.dimension_semantics<arbitrary>], iteration_bounds = array<i64: 1>, scalar_prefetch = 0 : i64, scratch_operands = 0 : i64, tpu.core_type = #tpu.core_type<tc>, window_params = [{transform_indices = @transform_0, window_bounds = array<i64: 36, 128>}, {pipeline_mode = #tpu.pipeline_mode<synchronous>, transform_indices = @transform_1, window_bounds = array<i64: 8, 36>}, {transform_indices = @transform_2, window_bounds = array<i64: 8, 128>}, {pipeline_mode = #tpu.pipeline_mode<synchronous>, transform_indices = @transform_3, window_bounds = array<i64: 8, 1>}, {pipeline_mode = #tpu.pipeline_mode<synchronous>, transform_indices = @transform_4, window_bounds = array<i64: 8, 1>}]} {
    %c0 = arith.constant 0 : index
    %c0_0 = arith.constant 0 : index
    %0 = vector.load %arg2[%c0, %c0_0] : memref<8x36xf32, #tpu.memory_space<vmem>>, vector<8x36xf32>
    %c0_1 = arith.constant 0 : index
    %c0_2 = arith.constant 0 : index
    %1 = vector.load %arg1[%c0_1, %c0_2] : memref<36x128xf32, #tpu.memory_space<vmem>>, vector<36x128xf32>
    %cst = arith.constant dense<0.000000e+00> : vector<8x128xf32>
    %2 = tpu.matmul %0, %1, %cst {dimension_numbers = #tpu.dot_dimension_numbers<[1], [0], [0], [1], [0, 0, 1, 1], [], []>} : vector<8x36xf32>, vector<36x128xf32>, vector<8x128xf32> -> vector<8x128xf32>
    %c0_3 = arith.constant 0 : index
    %c0_4 = arith.constant 0 : index
    %3 = vector.load %arg3[%c0_3, %c0_4] : memref<8x128xf32, #tpu.memory_space<vmem>>, vector<8x128xf32>
    tpu.vector_store %arg3[%c0_3, %c0_4], %2 {strides = array<i32>} : memref<8x128xf32, #tpu.memory_space<vmem>>, vector<8x128xf32>,
    %c0_i32 = arith.constant 0 : i32
    %4 = arith.cmpi eq, %arg0, %c0_i32 : i32
    %5 = arith.extui %4 : i1 to i32
    %c0_i32_5 = arith.constant 0 : i32
    %6 = arith.cmpi ne, %5, %c0_i32_5 : i32
    scf.if %6 {
      %cst_16 = arith.constant 0.000000e+00 : f32
      %18 = vector.broadcast %cst_16 : f32 to vector<8x1xf32>
      %c0_17 = arith.constant 0 : index
      %c0_18 = arith.constant 0 : index
      %19 = vector.load %arg4[%c0_17, %c0_18] : memref<8x1xf32, #tpu.memory_space<vmem>>, vector<8x1xf32>
      tpu.vector_store %arg4[%c0_17, %c0_18], %18 {strides = array<i32>} : memref<8x1xf32, #tpu.memory_space<vmem>>, vector<8x1xf32>,
      %cst_19 = arith.constant 0.000000e+00 : f32
      %20 = vector.broadcast %cst_19 : f32 to vector<8x1xf32>
      %c0_20 = arith.constant 0 : index
      %c0_21 = arith.constant 0 : index
      %21 = vector.load %arg5[%c0_20, %c0_21] : memref<8x1xf32, #tpu.memory_space<vmem>>, vector<8x1xf32>
      tpu.vector_store %arg5[%c0_20, %c0_21], %20 {strides = array<i32>} : memref<8x1xf32, #tpu.memory_space<vmem>>, vector<8x1xf32>,
    } else {
    }
    %c0_6 = arith.constant 0 : index
    %c0_7 = arith.constant 0 : index
    %7 = vector.load %arg4[%c0_6, %c0_7] : memref<8x1xf32, #tpu.memory_space<vmem>>, vector<8x1xf32>
    %cst_8 = arith.constant dense<0.000000e+00> : vector<8xf32>
    %8 = vector.multi_reduction <add>, %2, %cst_8 [1] : vector<8x128xf32> to vector<8xf32>
    %9 = vector.shape_cast %8 : vector<8xf32> to vector<8x1xf32>
    %10 = arith.addf %7, %9 : vector<8x1xf32>
    %c0_9 = arith.constant 0 : index
    %c0_10 = arith.constant 0 : index
    %11 = vector.load %arg4[%c0_9, %c0_10] : memref<8x1xf32, #tpu.memory_space<vmem>>, vector<8x1xf32>
    tpu.vector_store %arg4[%c0_9, %c0_10], %10 {strides = array<i32>} : memref<8x1xf32, #tpu.memory_space<vmem>>, vector<8x1xf32>,
    %c0_11 = arith.constant 0 : index
    %c0_12 = arith.constant 0 : index
    %12 = vector.load %arg5[%c0_11, %c0_12] : memref<8x1xf32, #tpu.memory_space<vmem>>, vector<8x1xf32>
    %13 = arith.mulf %2, %2 : vector<8x128xf32>
    %cst_13 = arith.constant dense<0.000000e+00> : vector<8xf32>
    %14 = vector.multi_reduction <add>, %13, %cst_13 [1] : vector<8x128xf32> to vector<8xf32>
    %15 = vector.shape_cast %14 : vector<8xf32> to vector<8x1xf32>
    %16 = arith.addf %12, %15 : vector<8x1xf32>
    %c0_14 = arith.constant 0 : index
    %c0_15 = arith.constant 0 : index
    %17 = vector.load %arg5[%c0_14, %c0_15] : memref<8x1xf32, #tpu.memory_space<vmem>>, vector<8x1xf32>
    tpu.vector_store %arg5[%c0_14, %c0_15], %16 {strides = array<i32>} : memref<8x1xf32, #tpu.memory_space<vmem>>, vector<8x1xf32>,
    return
  }
  func.func @transform_0(%arg0: i32) -> (i32, i32) {
    %c0_i32 = arith.constant 0 : i32
    %c0_i32_0 = arith.constant 0 : i32
    return %c0_i32, %arg0 : i32, i32
  }
  func.func @transform_1(%arg0: i32) -> (i32, i32) {
    %c0_i32 = arith.constant 0 : i32
    %c0_i32_0 = arith.constant 0 : i32
    %c0_i32_1 = arith.constant 0 : i32
    return %c0_i32, %c0_i32_0 : i32, i32
  }
  func.func @transform_2(%arg0: i32) -> (i32, i32) {
    %c0_i32 = arith.constant 0 : i32
    %c0_i32_0 = arith.constant 0 : i32
    return %c0_i32, %arg0 : i32, i32
  }
  func.func @transform_3(%arg0: i32) -> (i32, i32) {
    %c0_i32 = arith.constant 0 : i32
    %c0_i32_0 = arith.constant 0 : i32
    %c0_i32_1 = arith.constant 0 : i32
    return %c0_i32, %c0_i32_0 : i32, i32
  }
  func.func @transform_4(%arg0: i32) -> (i32, i32) {
    %c0_i32 = arith.constant 0 : i32
    %c0_i32_0 = arith.constant 0 : i32
    %c0_i32_1 = arith.constant 0 : i32
    return %c0_i32, %c0_i32_0 : i32, i32
  }
}

</mosaic_0001>

<bundles_post_ra>
// kernel: tpu_custom_call.1
= control target key start
LH: loop header
LB: loop body
LE: loop exit
PB: predicated region body
PF: predicated region fallthrough
CT: control target
= control target key end

     0   :  { %10 = vsyncpa [#allocation3], 0  ;;  %s326_s0 = inlined_call_operand.hbm [shape: f32[36,128], index: 0, kind: input, shape index: {}]   ;;  %s327_s1 = inlined_call_operand.hbm [shape: f32[8,36], index: 1, kind: input, shape index: {}]   ;;  %s328_s2 = inlined_call_operand.hbm [shape: f32[8,128], index: 2, kind: output, shape index: {0}]   ;;  %s329_s3 = inlined_call_operand.vmem [shape: f32[8,1], index: 3, kind: output, shape index: {1}]   ;;  %s330_s4 = inlined_call_operand.vmem [shape: f32[8,1], index: 4, kind: output, shape index: {2}]  }
   0x1   :  { %11 = vsyncpa [#allocation6], 0 }
   0x2   :  { %12 = vsyncpa [#allocation4], 0  ;;  %s263_s15 = smov [#allocation2]  }
   0x3   :  { %s18_s16 = sshll.u32 %s263_s15, 4  ;;  %s19_s16 = int_to_ptr.vmem [resolvable:$true] %s18_s16 }
   0x4   :  { %s205_s17 = scalar_lea.vmem %s19_s16, 640  ;;  %p210_p1 = scmp.lt.s32.totalorder %s19_s16, %s19_s16 }
   0x5   :  { %p206_p0 = scmp.ne.s32.totalorder %s19_s16, %s205_s17  ;;  %p211_p2 = scmp.lt.s32.totalorder %s205_s17, %s205_s17 }
   0x7   :  { %p212_p3 = por %p211_p2, %p210_p1 }
   0x9   :  { %p213_p4 = pnand %p212_p3, %p206_p0 }
   0xb   :  { %216 = shalt.err (!%p213_p4)
}
   0xc   :  { %s264_s18 = smov 128   ;;  %s265_s19 = smov 8  }
   0xd   :  { %24 = dma.hbm_to_vmem [thread:$0]  %s326_s0, 640, %s19_s16, [#allocation3], %s264_s18, %s264_s18, %s265_s19  }
   0xe   :  { %s266_s22 = smov [#allocation5]  }
   0xf   :  { %s31_s23 = sshll.u32 %s266_s22, 4  ;;  %s32_s23 = int_to_ptr.vmem [resolvable:$true] %s31_s23 }
  0x10   :  { %s225_s24 = scalar_lea.vmem %s32_s23, 128  ;;  %p230_p6 = scmp.lt.s32.totalorder %s32_s23, %s32_s23 }
  0x11   :  { %p226_p5 = scmp.ne.s32.totalorder %s32_s23, %s225_s24  ;;  %p231_p7 = scmp.lt.s32.totalorder %s225_s24, %s225_s24 }
  0x13   :  { %p232_p8 = por %p231_p7, %p230_p6 }
  0x15   :  { %p233_p9 = pnand %p232_p8, %p226_p5 }
  0x17   :  { %236 = shalt.err (!%p233_p9)
}
  0x18   :  { %34 = dma.hbm_to_vmem [thread:$0]  %s327_s1, 128, %s32_s23, [#allocation6]  }
  0x19   :  { %257 = dma.done.wait [#allocation3], 640  }
  0x1a   :  { %258 = vsyncadd [#allocation3], 4294966656 }
  0x1b   :  { %259 = dma.done.wait [#allocation6], 128  }
  0x1c   :  { %260 = vsyncadd [#allocation6], 4294967168  ;;  %v267_v0 = vmov 0.0   ;;  %vm268_vm0 = vmmov 0   ;;  %vm51_vm1 = vcmask 1043456   ;;  %v45_v2 = vld [vmem:[#allocation2 + $0x18] sm:$0xff] }
  0x1d   :  { %177 = vmatprep.subr.mxu0 %v267_v0  ;;  %187 = vmatprep.mubr.msk.f32.mxu0 %vm268_vm0, %v267_v0  ;;  %v46_v1 = vld [vmem:[#allocation2 + $0x20] sm:$0xf]  ;;  %v44_v3 = vld [vmem:[#allocation2 + $0x10] sm:$0xff]  ;;  %v43_v4 = vld [vmem:[#allocation2 + $0x8] sm:$0xff]  ;;  %vm47_vm2 = vcmask 293888   ;;  %vm130_vm3 = vcmask 7168  }
  0x1e   :  { %178 = vmatpush3.msk.msra.mxu0 %vm51_vm1, %v46_v1  ;;  %v42_v5 = vld [vmem:[#allocation2] sm:$0xff]  ;;  %v41_v6 = vld [vmem:[#allocation5] sm:$0xff]  ;;  %131 = vst.msk [vmem:[%s329_s3] sm:$0xff] %vm130_vm3, %v267_v0  ;;  %132 = vst.msk [vmem:[%s330_s4] sm:$0xff] %vm130_vm3, %v267_v0  ;;  %s269_s29 = smov [#allocation7]  }
  0x1f   :  { %179 = vmatprep.subr.mxu0 %v267_v0  ;;  %s151_s30 = sshll.u32 %s269_s29, 4  ;;  %s152_s30 = int_to_ptr.vmem [resolvable:$true] %s151_s30 }
  0x20   :  { %180 = vmatpush3.msra.mxu0 %v45_v2  ;;  %s237_s5 = scalar_lea.vmem %s152_s30, 128  ;;  %p242_p11 = scmp.lt.s32.totalorder %s152_s30, %s152_s30 }
  0x21   :  { %181 = vmatprep.subr.mxu0 %v267_v0  ;;  %p238_p10 = scmp.ne.s32.totalorder %s152_s30, %s237_s5  ;;  %p243_p12 = scmp.lt.s32.totalorder %s237_s5, %s237_s5 }
  0x22   :  { %182 = vmatpush3.msra.mxu0 %v44_v3 }
  0x23   :  { %183 = vmatprep.subr.mxu0 %v267_v0  ;;  %p244_p13 = por %p243_p12, %p242_p11 }
  0x24   :  { %184 = vmatpush3.msra.mxu0 %v43_v4 }
  0x25   :  { %185 = vmatprep.subr.mxu0 %v267_v0  ;;  %p245_p0 = pnand %p244_p13, %p238_p10 }
  0x26   :  { %186 = vmatpush3.msra.mxu0 %v42_v5 }
  0x27   :  { %188 = vmatmul.mubr.msk.f32.vlgmr.msra.gmra.mxu0 %vm47_vm2, %v41_v6 }
  0xe7   :  { %v121_v7 = vpop.f32.mrf.mxu0 }
  0xe8   :  { %125 = vst [vmem:[#allocation7] sm:$0xff] %v121_v7  ;;  %134 = vadd.xlane.f32.xlu0 %v121_v7  ;;  %v140_v9 = vmul.f32 %v121_v7, %v121_v7 }
  0xe9   :  { %v189_v8 = vpop.f32.mrf.mxu0 }
  0xec   :  { %141 = vadd.xlane.f32.xlu0 %v140_v9 }
  0xed   :  { %248 = shalt.err (!%p245_p0)
}
  0xee   :  { %154 = dma.vmem_to_hbm [thread:$0]  %s152_s30, 128, %s328_s2, [#allocation4]   ;;  %v133_v10 = vld [vmem:[%s329_s3] sm:$0xff] }
  0xef   :  { %v139_v13 = vld [vmem:[%s330_s4] sm:$0xff] }
 0x171   :  { %v135_v11 = vpop.xlane.xlu0 %134 }
 0x172   :  { %v136_v12 = vadd.f32 %v135_v11, %v133_v10 }
 0x174   :  { %138 = vst.msk [vmem:[%s329_s3] sm:$0xff] %vm130_vm3, %v136_v12 }
 0x175   :  { %v142_v14 = vpop.xlane.xlu0 %141 }
 0x176   :  { %v143_v15 = vadd.f32 %v142_v14, %v139_v13 }
 0x178   :  { %144 = vst.msk [vmem:[%s330_s4] sm:$0xff] %vm130_vm3, %v143_v15 }
 0x179   :  { %261 = dma.done.wait [#allocation4], 128  }
 0x17a   :  { %262 = vsyncadd [#allocation4], 4294967168 }
 0x17b   :  { %166 = vsyncpa [#allocation3], 1 }
 0x17c   :  { %167 = vsyncpa [#allocation6], 1 }
 0x17d   :  { %168 = vsyncpa [#allocation4], 1 }

</bundles_post_ra>
